<compile_context>
chip_gen: v7x
topology: tpu7x:2x2x1
jax: 0.10.0
libtpu: 0.0.40
codegen_flags: <defaults>
</compile_context>

<pallas_src>
import jax
import jax.numpy as jnp
from jax import lax
from jax.experimental import pallas as pl
from jax.experimental.pallas import tpu as pltpu


# ----------------------------- Pallas kernel -------------------------------
def _fwd_kernel(p_ref, w_ref, bc_ref, s_ref, wf_ref, za_ref, out_ref):
    # p_ref  : (9C, V)   bf16  im2col patches, V = b_blk*H*W on the lane axis
    # w_ref  : (F, 9C)   bf16  conv weights, column k = (kh*3 + kw)*C + c
    # bc_ref : (F, 1)    f32   conv bias
    # s_ref  : (V, B)    bf16/f32 block-diagonal pooling matrix (entries 1/(H*W))
    # wf_ref : (1, F)    f32   head column 0, backbone-feature part
    # za_ref : (1, 1, B) f32   precomputed add_x @ whead[F:, 0] + bhead[0]
    # out_ref: (1, 1, B) f32   y[:, 0] for this batch block (lane-major)

    # 3x3 SAME conv as ONE K=36 MXU GEMM with f32 accumulation, then bias + ReLU.
    conv = jnp.dot(w_ref[...], p_ref[...],
                   preferred_element_type=jnp.float32)             # (F, V)
    feat = jnp.maximum(conv + bc_ref[...], 0.0)                     # (F, V) f32

    # Global-average-pool on the MXU (1/(H*W) folded into s_ref, valid pixels only),
    # then the single head column that forward() actually returns.
    pooled = jnp.dot(feat.astype(s_ref.dtype), s_ref[...],
                     preferred_element_type=jnp.float32)            # (F, B)
    z = jnp.dot(wf_ref[...], pooled,
                preferred_element_type=jnp.float32)                 # (1, B)

    out_ref[...] = z[None] + za_ref[...]                            # (1, 1, B)


# ------------------------------- wrapper ------------------------------------
def custom_model_addemb_forward(x_nchw, add_x, params, *, b_blk=None):
    """Pallas equivalent of CustomModelAddEmb.forward: returns y[:, 0], shape (N,)."""
    wconv = params["wconv"]            # (F, C, 3, 3)  OIHW
    bconv = params["bconv"]            # (F,)
    whead = params["whead"]            # (F + A, NC)
    bhead = params["bhead"]            # (NC,)

    n, c, h, w = x_nchw.shape
    f = wconv.shape[0]
    hw = h * w
    kk = 9 * c                          # im2col depth (3*3*C)

    # Batch blocking: b_blk <= N (no padded-batch waste) and, for N >= 2, at least
    # two grid steps so the "parallel" grid axis can use both v7x TensorCores.
    if b_blk is None:
        b_blk = max(1, min(8, n // 2))
    n_pad = pl.cdiv(n, b_blk) * b_blk
    n_steps = n_pad // b_blk
    v = b_blk * hw                      # pixels per grid step (lane axis)

    # ---------------- layout-only glue (runs once, in XLA) ----------------
    # SAME pad + lightweight im2col, transposed so the spatial axis is minor
    # (lane-dense): patches[(kh*3+kw)*C + c, n*HW + i*W + j] = x_pad[n, c, i+kh, j+kw]
    xb = x_nchw.astype(jnp.bfloat16)
    xb = jnp.pad(xb, ((0, n_pad - n), (0, 0), (1, 1), (1, 1)))
    taps = [xb[:, :, di:di + h, dj:dj + w] for di in range(3) for dj in range(3)]
    patches = jnp.stack(taps, axis=0)                          # (9, n_pad, C, H, W)
    patches = jnp.transpose(patches, (0, 2, 1, 3, 4))          # (9, C, n_pad, H, W)
    patches = patches.reshape(kk, n_pad * hw)                  # (9C, n_pad*HW) bf16

    # conv weights (F, C, 3, 3) OIHW -> (F, 3, 3, C) -> (F, 9C), bf16
    w36 = jnp.transpose(wconv, (0, 2, 3, 1)).reshape(f, kk).astype(jnp.bfloat16)
    bc = bconv.reshape(f, 1).astype(jnp.float32)

    # Block-diagonal pooling matrix over valid pixels only; bf16 iff 1/(H*W) exact.
    pool_dtype = jnp.bfloat16 if (hw & (hw - 1)) == 0 else jnp.float32
    s_pool = (jnp.repeat(jnp.eye(b_blk, dtype=jnp.float32), hw, axis=0)
              * (1.0 / hw)).astype(pool_dtype)                  # (V, B)

    # Head column 0 (the only one forward() returns), split into the backbone part
    # (kernel) and the add_x part + bias (tiny XLA dot precomputed here).
    wf = whead[:f, 0].reshape(1, f).astype(jnp.float32)         # (1, F)
    za = (add_x.astype(jnp.float32) @ whead[f:, 0:1].astype(jnp.float32)
          + bhead[0].astype(jnp.float32))                       # (N, 1)
    za = jnp.pad(za[:, 0], (0, n_pad - n)).reshape(n_steps, 1, b_blk)

    out = pl.pallas_call(
        _fwd_kernel,
        out_shape=jax.ShapeDtypeStruct((n_steps, 1, b_blk), jnp.float32),
        grid_spec=pltpu.PrefetchScalarGridSpec(
            num_scalar_prefetch=0,
            grid=(n_steps,),
            in_specs=[
                pl.BlockSpec((kk, v), lambda b: (0, b)),            # patches (bf16)
                pl.BlockSpec((f, kk), lambda b: (0, 0)),            # conv weights
                pl.BlockSpec((f, 1), lambda b: (0, 0)),             # conv bias
                pl.BlockSpec((v, b_blk), lambda b: (0, 0)),         # pooling matrix
                pl.BlockSpec((1, f), lambda b: (0, 0)),             # head col0 (feat)
                pl.BlockSpec((1, 1, b_blk), lambda b: (b, 0, 0)),   # add_x head part
            ],
            out_specs=pl.BlockSpec((1, 1, b_blk), lambda b: (b, 0, 0)),
        ),
        compiler_params=pltpu.CompilerParams(
            dimension_semantics=("parallel",)),
    )(patches, w36, bc, s_pool, wf, za)

    return out.reshape(-1)[:n]                                   # (N,)


# ------------------------- pure-JAX reference --------------------------------
def reference_forward(x_nchw, add_x, params, *, mimic_kernel_casts=False):
    wconv, bconv, whead, bhead = (params["wconv"], params["bconv"],
                                  params["whead"], params["bhead"])
    if mimic_kernel_casts:
        x_nchw = x_nchw.astype(jnp.bfloat16).astype(jnp.float32)
        wconv = wconv.astype(jnp.bfloat16).astype(jnp.float32)
    y = lax.conv_general_dilated(
        x_nchw, wconv, window_strides=(1, 1), padding="SAME",
        dimension_numbers=("NCHW", "OIHW", "NCHW"))
    y = jnp.maximum(y + bconv.reshape(1, -1, 1, 1), 0.0)
    if mimic_kernel_casts:
        y = y.astype(jnp.bfloat16).astype(jnp.float32)
    feat = jnp.mean(y, axis=(2, 3))                              # (N, F)
    logits = jnp.concatenate([feat, add_x], axis=1) @ whead + bhead
    return logits[:, 0]


# --------------------------------- main --------------------------------------
if __name__ == "__main__":
    # Small shapes consistent with the module: cfg.ch=4, cfg.num_classes=8,
    # cfg.freq_div_n=10 -> add_x dim = 500//10 - 40//10 + 1 = 47.
    N, C, H, W = 2, 4, 16, 16
    HIDDEN, NUM_CLASSES = 32, 8
    FREQ_DIV_N = 10
    ADD_DIM = 500 // FREQ_DIV_N - 40 // FREQ_DIV_N + 1           # 47

    key = jax.random.PRNGKey(0)
    kx, ka, kw1, kb1, kw2, kb2 = jax.random.split(key, 6)

    x = jax.random.normal(kx, (N, C, H, W), dtype=jnp.float32)
    add_x = jax.random.normal(ka, (N, ADD_DIM), dtype=jnp.float32)
    params = {
        "wconv": 0.1 * jax.random.normal(kw1, (HIDDEN, C, 3, 3), jnp.float32),
        "bconv": 0.1 * jax.random.normal(kb1, (HIDDEN,), jnp.float32),
        "whead": 0.1 * jax.random.normal(kw2, (HIDDEN + ADD_DIM, NUM_CLASSES),
                                         jnp.float32),
        "bhead": 0.1 * jax.random.normal(kb2, (NUM_CLASSES,), jnp.float32),
    }

    out = jax.jit(custom_model_addemb_forward)(x, add_x, params)
    out = jax.block_until_ready(out)
    assert out.shape == (N,), out.shape

    # Tight check vs a cast-matched reference (x / conv weights rounded to bf16 and
    # features rounded to bf16 before pooling, matching the kernel's arithmetic).
    ref_cast = reference_forward(x, add_x, params, mimic_kernel_casts=True)
    assert jnp.allclose(out, ref_cast, atol=3e-4, rtol=3e-4), (out, ref_cast)

    # Loose check vs the full-f32 module semantics (difference is only the bf16
    # rounding of x / conv weights / pooled features).
    ref_f32 = reference_forward(x, add_x, params)
    assert jnp.allclose(out, ref_f32, atol=2e-2, rtol=2e-2), (out, ref_f32)

    print("KERNEL_OK")
</pallas_src>

<mosaic_0001>
module attributes {stable_mosaic.version = 11 : i64} {
  func.func @_fwd_kernel(%arg0: i32, %arg1: memref<36x256xbf16, #tpu.memory_space<vmem>>, %arg2: memref<32x36xbf16, #tpu.memory_space<vmem>>, %arg3: memref<32x1xf32, #tpu.memory_space<vmem>>, %arg4: memref<256x1xbf16, #tpu.memory_space<vmem>>, %arg5: memref<1x32xf32, #tpu.memory_space<vmem>>, %arg6: memref<1x1x1xf32, #tpu.memory_space<vmem>>, %arg7: memref<1x1x1xf32, #tpu.memory_space<vmem>>) attributes {dimension_semantics = [#tpu.dimension_semantics<parallel>], iteration_bounds = array<i64: 2>, scalar_prefetch = 0 : i64, scratch_operands = 0 : i64, tpu.core_type = #tpu.core_type<tc>, window_params = [{transform_indices = @transform_0, window_bounds = array<i64: 36, 256>}, {pipeline_mode = #tpu.pipeline_mode<synchronous>, transform_indices = @transform_1, window_bounds = array<i64: 32, 36>}, {pipeline_mode = #tpu.pipeline_mode<synchronous>, transform_indices = @transform_2, window_bounds = array<i64: 32, 1>}, {pipeline_mode = #tpu.pipeline_mode<synchronous>, transform_indices = @transform_3, window_bounds = array<i64: 256, 1>}, {pipeline_mode = #tpu.pipeline_mode<synchronous>, transform_indices = @transform_4, window_bounds = array<i64: 1, 32>}, {transform_indices = @transform_5, window_bounds = array<i64: 1, 1, 1>}, {transform_indices = @transform_6, window_bounds = array<i64: 1, 1, 1>}]} {
    %c0 = arith.constant 0 : index
    %c0_0 = arith.constant 0 : index
    %0 = vector.load %arg2[%c0, %c0_0] : memref<32x36xbf16, #tpu.memory_space<vmem>>, vector<32x36xbf16>
    %c0_1 = arith.constant 0 : index
    %c0_2 = arith.constant 0 : index
    %1 = vector.load %arg1[%c0_1, %c0_2] : memref<36x256xbf16, #tpu.memory_space<vmem>>, vector<36x256xbf16>
    %cst = arith.constant dense<0.000000e+00> : vector<32x256xf32>
    %2 = tpu.matmul %0, %1, %cst {dimension_numbers = #tpu.dot_dimension_numbers<[1], [0], [0], [1], [0, 0, 1, 1], [], []>} : vector<32x36xbf16>, vector<36x256xbf16>, vector<32x256xf32> -> vector<32x256xf32>
    %c0_3 = arith.constant 0 : index
    %c0_4 = arith.constant 0 : index
    %3 = vector.load %arg3[%c0_3, %c0_4] : memref<32x1xf32, #tpu.memory_space<vmem>>, vector<32x1xf32>
    %4 = vector.broadcast %3 : vector<32x1xf32> to vector<32x256xf32>
    %5 = arith.addf %2, %4 : vector<32x256xf32>
    %cst_5 = arith.constant 0.000000e+00 : f32
    %6 = vector.broadcast %cst_5 : f32 to vector<32x256xf32>
    %7 = arith.maximumf %5, %6 : vector<32x256xf32>
    %8 = arith.truncf %7 : vector<32x256xf32> to vector<32x256xbf16>
    %c0_6 = arith.constant 0 : index
    %c0_7 = arith.constant 0 : index
    %9 = vector.load %arg4[%c0_6, %c0_7] : memref<256x1xbf16, #tpu.memory_space<vmem>>, vector<256x1xbf16>
    %cst_8 = arith.constant dense<0.000000e+00> : vector<32x1xf32>
    %10 = tpu.matmul %8, %9, %cst_8 {dimension_numbers = #tpu.dot_dimension_numbers<[1], [0], [0], [1], [0, 0, 1, 1], [], []>} : vector<32x256xbf16>, vector<256x1xbf16>, vector<32x1xf32> -> vector<32x1xf32>
    %c0_9 = arith.constant 0 : index
    %c0_10 = arith.constant 0 : index
    %11 = vector.load %arg5[%c0_9, %c0_10] : memref<1x32xf32, #tpu.memory_space<vmem>>, vector<1x32xf32>
    %cst_11 = arith.constant dense<0.000000e+00> : vector<1x1xf32>
    %12 = tpu.matmul %11, %10, %cst_11 {dimension_numbers = #tpu.dot_dimension_numbers<[1], [0], [0], [1], [0, 0, 1, 1], [], []>} : vector<1x32xf32>, vector<32x1xf32>, vector<1x1xf32> -> vector<1x1xf32>
    %13 = vector.shape_cast %12 : vector<1x1xf32> to vector<1x1x1xf32>
    %c0_12 = arith.constant 0 : index
    %c0_13 = arith.constant 0 : index
    %c0_14 = arith.constant 0 : index
    %14 = vector.load %arg6[%c0_12, %c0_13, %c0_14] : memref<1x1x1xf32, #tpu.memory_space<vmem>>, vector<1x1x1xf32>
    %15 = arith.addf %13, %14 : vector<1x1x1xf32>
    %c0_15 = arith.constant 0 : index
    %c0_16 = arith.constant 0 : index
    %c0_17 = arith.constant 0 : index
    %16 = vector.load %arg7[%c0_15, %c0_16, %c0_17] : memref<1x1x1xf32, #tpu.memory_space<vmem>>, vector<1x1x1xf32>
    tpu.vector_store %arg7[%c0_15, %c0_16, %c0_17], %15 {strides = array<i32>} : memref<1x1x1xf32, #tpu.memory_space<vmem>>, vector<1x1x1xf32>,
    return
  }
  func.func @transform_0(%arg0: i32) -> (i32, i32) {
    %c0_i32 = arith.constant 0 : i32
    %c0_i32_0 = arith.constant 0 : i32
    return %c0_i32, %arg0 : i32, i32
  }
  func.func @transform_1(%arg0: i32) -> (i32, i32) {
    %c0_i32 = arith.constant 0 : i32
    %c0_i32_0 = arith.constant 0 : i32
    %c0_i32_1 = arith.constant 0 : i32
    return %c0_i32, %c0_i32_0 : i32, i32
  }
  func.func @transform_2(%arg0: i32) -> (i32, i32) {
    %c0_i32 = arith.constant 0 : i32
    %c0_i32_0 = arith.constant 0 : i32
    %c0_i32_1 = arith.constant 0 : i32
    return %c0_i32, %c0_i32_0 : i32, i32
  }
  func.func @transform_3(%arg0: i32) -> (i32, i32) {
    %c0_i32 = arith.constant 0 : i32
    %c0_i32_0 = arith.constant 0 : i32
    %c0_i32_1 = arith.constant 0 : i32
    return %c0_i32, %c0_i32_0 : i32, i32
  }
  func.func @transform_4(%arg0: i32) -> (i32, i32) {
    %c0_i32 = arith.constant 0 : i32
    %c0_i32_0 = arith.constant 0 : i32
    %c0_i32_1 = arith.constant 0 : i32
    return %c0_i32, %c0_i32_0 : i32, i32
  }
  func.func @transform_5(%arg0: i32) -> (i32, i32, i32) {
    %c0_i32 = arith.constant 0 : i32
    %c0_i32_0 = arith.constant 0 : i32
    %c0_i32_1 = arith.constant 0 : i32
    return %arg0, %c0_i32, %c0_i32_0 : i32, i32, i32
  }
  func.func @transform_6(%arg0: i32) -> (i32, i32, i32) {
    %c0_i32 = arith.constant 0 : i32
    %c0_i32_0 = arith.constant 0 : i32
    %c0_i32_1 = arith.constant 0 : i32
    return %arg0, %c0_i32, %c0_i32_0 : i32, i32, i32
  }
}

</mosaic_0001>

<bundles_post_ra>
// kernel: custom_model_addemb_forward.1
= control target key start
LH: loop header
LB: loop body
LE: loop exit
PB: predicated region body
PF: predicated region fallthrough
CT: control target
= control target key end

     0   :  { %s989_s21 = smov 0   ;;  %s991_s22 = smov 0   ;;  %s1115_s0 = inlined_call_operand.vmem [shape: bf16[36,512], index: 0, kind: input, shape index: {}]   ;;  %s1116_s1 = inlined_call_operand.vmem [shape: bf16[32,36], index: 1, kind: input, shape index: {}]   ;;  %s1117_s2 = inlined_call_operand.vmem [shape: f32[32,1], index: 2, kind: input, shape index: {}]   ;;  %s1118_s3 = inlined_call_operand.vmem [shape: bf16[256,1], index: 3, kind: input, shape index: {}]   ;;  %s1119_s4 = inlined_call_operand.vmem [shape: f32[1,32], index: 4, kind: input, shape index: {}]   ;;  %s1120_s5 = inlined_call_operand.vmem [shape: f32[2,1,1], index: 5, kind: input, shape index: {}]   ;;  %s1121_s6 = inlined_call_operand.vmem [shape: f32[2,1,1], index: 6, kind: output, shape index: {}]  }
   0x1   :  { %s993_s23 = smov 0  }
   0x2 LB: > { %s780_s24 = sadd.s32 4294967295, %s948_s23   ;;  %s1006_s25 = sadd.s32 1, %s948_s23   ;;  %s948_s23 = sphi %s993_s23, %s1124_s23   ;;  %s944_s22 = sphi %s991_s22, %s1123_s22   ;;  %s940_s21 = sphi %s989_s21, %s1122_s21  }
   0x3   : > { %s20_s26 = ssub.s32 %s948_s23, %s1006_s25  ;;  %s23_s27 = sadd.s32 1, %s944_s22 }
   0x4   : > { %p21_p0 = scmp.eq.s32.totalorder %s20_s26, 0  ;;  %p30_p1 = scmp.ne.s32.totalorder %s944_s22, %s940_s21 }
   0x5   : > { %p31_p2 = scmp.eq.s32.totalorder %s948_s23, 0  ;;  %p783_p4 = scmp.ge.s32.totalorder %s948_s23, 2 }
   0x6   : > { %s1015_s28 = scalar_select %p21_p0, %s944_s22, %s23_s27  }
   0x7   : > { %p32_p3 = por %p31_p2, %p30_p1  ;;  %204 = sbr.rel (%p783_p4) target bundleno = 21 (0x15), region = 32 }
   0xe   : > { %207 = sbr.rel (!%p32_p3) target bundleno = 21 (0x15), region = 36  ;;  %s209_s29 = sand.u32 (%p32_p3), 1, %s944_s22  }
   0xf   : > { %s817_s30 = sshll.u32 (%p32_p3), %s948_s23, 3  ;;  %s868_s7 = smul.u32 (%p32_p3), 40, %s209_s29 }
  0x10   : > { %s214_s10 = scalar_lea.vmem (%p32_p3), %s1115_s0, %s817_s30 }
  0x11   : > { %v250_v0 = vld [vmem:[%s214_s10] sm:$0xff] (%p32_p3)  ;;  %v252_v1 = vld [vmem:[%s214_s10 + $0x10] sm:$0xff] (%p32_p3)  ;;  %s211_s11 = scalar_lea.vmem (%p32_p3), [#allocation2], %s868_s7 }
  0x12   : > { %v254_v2 = vld [vmem:[%s214_s10 + $0x20] sm:$0xff] (%p32_p3)  ;;  %v256_v3 = vld [vmem:[%s214_s10 + $0x30] sm:$0xff] (%p32_p3)  ;;  %251 = vst [vmem:[%s211_s11] sm:$0xff] (%p32_p3), %v250_v0  ;;  %253 = vst [vmem:[%s211_s11 + $0x8] sm:$0xff] (%p32_p3), %v252_v1 }
  0x13   : > { %v258_v4 = vld [vmem:[%s214_s10 + $0x40] sm:$0xff] (%p32_p3)  ;;  %255 = vst [vmem:[%s211_s11 + $0x10] sm:$0xff] (%p32_p3), %v254_v2  ;;  %257 = vst [vmem:[%s211_s11 + $0x18] sm:$0xff] (%p32_p3), %v256_v3 }
  0x14   : > { %259 = vst [vmem:[%s211_s11 + $0x20] sm:$0xff] (%p32_p3), %v258_v4 }
  0x15 PF: > { %p786_p5 = scmp.ge.s32.totalorder %s948_s23, 1  ;;  %p270_p6 = scmp.lt.s32.totalorder %s948_s23, 3 }
  0x17   : > { %p271_p7 = pnand %p786_p5, %p270_p6 }
  0x18   : > { %s277_s12 = sand.u32 (!%p271_p7), 1, %s940_s21   ;;  %v950_v5 = vmov (!%p271_p7), 0   ;;  %v324_v6 = vld [vmem:[%s1117_s2] sm:$0xff] (!%p271_p7)  ;;  %v325_v7 = vld [vmem:[%s1117_s2 + $0x8] sm:$0xff] (!%p271_p7)  ;;  %v326_v8 = vld [vmem:[%s1117_s2 + $0x10] sm:$0xff] (!%p271_p7)  ;;  %vm390_vm0 = vcmask (!%p271_p7), 1041408  }
  0x19   : > { %274 = sbr.rel (%p271_p7) target bundleno = 709 (0x2c5), region = 78  ;;  %429 = vmatprep.mubr.bf16.mxu0 (!%p271_p7), %v950_v5  ;;  %898 = vset.pattern.permute.xlu0 (!%p271_p7), %v950_v5  ;;  %v327_v9 = vld [vmem:[%s1117_s2 + $0x18] sm:$0xff] (!%p271_p7)  ;;  %v910_v15 = vld [vmem:[%s1118_s3 + $0x40] sm:$0xff] (!%p271_p7)   ;;  %v912_v19 = vld [vmem:[%s1118_s3 + $0x48] sm:$0xff] (!%p271_p7)   ;;  %vm383_vm1 = vcmask (!%p271_p7), 293888   ;;  %v951_v4 = vmov (!%p271_p7), 0.0|0.0  }
  0x1a   : > { %s869_s13 = smul.u32 (!%p271_p7), 40, %s277_s12  ;;  %899 = vset.pattern.permute.xlu1 (!%p271_p7), %v950_v5  ;;  %330 = vperm.xlu0 (!%p271_p7), %898, %v324_v6   ;;  %v911_v18 = vld [vmem:[%s1118_s3] sm:$0xff] (!%p271_p7)   ;;  %v913_v20 = vld [vmem:[%s1118_s3 + $0x8] sm:$0xff] (!%p271_p7)   ;;  %v914_v21 = vld [vmem:[%s1118_s3 + $0x50] sm:$0xff] (!%p271_p7)   ;;  %vm952_vm2 = vmmov (!%p271_p7), 0   ;;  %vm640_vm3 = vcmask (!%p271_p7), 261120  }
  0x1b   : > { %340 = vperm.xlu1 (!%p271_p7), %899, %v326_v8   ;;  %818 = vmatprep.subr.bf16.mxu1 (!%p271_p7), %v910_v15  ;;  %v908_v23 = vld [vmem:[%s1116_s1] sm:$0xff] (!%p271_p7)   ;;  %v915_v24 = vld [vmem:[%s1118_s3 + $0x10] sm:$0xff] (!%p271_p7)   ;;  %v916_v25 = vld [vmem:[%s1118_s3 + $0x58] sm:$0xff] (!%p271_p7)   ;;  %p308_p8 = scmp.lt.s32.totalorder (!%p271_p7), %s780_s24, 1  ;;  %vm716_vm4 = vcmask (!%p271_p7), 0  }
  0x1c   : > { %s279_s26 = scalar_lea.vmem (!%p271_p7), [#allocation2], %s869_s13  ;;  %819 = vmatpush3.bf16.msra.mxu1 (!%p271_p7), %v911_v18  ;;  %v917_v26 = vld [vmem:[%s1118_s3 + $0x18] sm:$0xff] (!%p271_p7)   ;;  %v918_v27 = vld [vmem:[%s1118_s3 + $0x60] sm:$0xff] (!%p271_p7)   ;;  %v909_v28 = vld [vmem:[%s1116_s1 + $0x8] sm:$0xff] (!%p271_p7)  }
  0x1d   : > { %v900_v10 = vld [vmem:[%s279_s26 + $0x4] ss:$8 sps:$4 sm:$0xff] (!%p271_p7)   ;;  %v902_v11 = vld [vmem:[%s279_s26] ss:$8 sps:$4 sm:$0xff] (!%p271_p7)   ;;  %v903_v12 = vld [vmem:[%s279_s26 + $0x14] ss:$8 sps:$4 sm:$0xff] (!%p271_p7)   ;;  %820 = vmatprep.subr.bf16.mxu1 (!%p271_p7), %v912_v19 }
  0x1e   : > { %397 = vmatprep.subr.bf16.mxu0 (!%p271_p7), %v900_v10  ;;  %v905_v13 = vld [vmem:[%s279_s26 + $0x10] ss:$8 sps:$4 sm:$0xff] (!%p271_p7)   ;;  %v323_v14 = vld [vmem:[%s279_s26 + $0x20] sm:$0x33] (!%p271_p7)  ;;  %335 = vperm.xlu0 (!%p271_p7), %898, %v325_v7  }
  0x1f   : > { %398 = vmatpush1.bf16.msra.mxu0 (!%p271_p7), %v902_v11  ;;  %v794_v16 = vcombine.high (!%p271_p7), %v323_v14, %v323_v14  ;;  %v793_v17 = vcombine.low (!%p271_p7), %v323_v14, %v323_v14  ;;  %345 = vperm.xlu1 (!%p271_p7), %899, %v327_v9   ;;  %v919_v29 = vld [vmem:[%s1118_s3 + $0x20] sm:$0xff] (!%p271_p7)   ;;  %v920_v30 = vld [vmem:[%s1118_s3 + $0x68] sm:$0xff] (!%p271_p7)   ;;  %v922_v32 = vld [vmem:[%s1118_s3 + $0x70] sm:$0xff] (!%p271_p7)  }
  0x20   : > { %399 = vmatprep.subr.bf16.mxu0 %v903_v12  ;;  %821 = vmatpush3.bf16.msra.mxu1 %v913_v20  ;;  %v921_v31 = vld [vmem:[%s1118_s3 + $0x28] sm:$0xff]   ;;  %v923_v33 = vld [vmem:[%s1118_s3 + $0x30] sm:$0xff]   ;;  %v924_v34 = vld [vmem:[%s1118_s3 + $0x78] sm:$0xff]   ;;  %s1126_s24 = smov (!%p308_p8, %s780_s24), 1 }
  0x21   : > { %v392_v22 = vsel %vm390_vm0, %v793_v17, 0  ;;  %822 = vmatprep.subr.bf16.mxu1 %v914_v21  ;;  %v925_v35 = vld [vmem:[%s1118_s3 + $0x38] sm:$0xff]   ;;  %v639_v20 = vld [vmem:[%s1119_s4] sm:$0x1]  ;;  %s310_s30 = scalar_lea.vmem %s1120_s5, %s1126_s24  ;;  %s313_s9 = scalar_lea.vmem %s1121_s6, %s1126_s24 }
  0x22   : > { %v714_v21 = vld [vmem:[%s310_s30] sm:$0x1] }
  0x23   : > { %400 = vmatpush1.bf16.msra.mxu0 %v905_v13 }
  0x24   : > { %795 = vmatprep.subr.msk.bf16.mxu0 %vm390_vm0, %v794_v16  ;;  %823 = vmatpush3.bf16.msra.mxu1 %v915_v24 }
  0x25   : > { %824 = vmatprep.subr.bf16.mxu1 %v916_v25 }
  0x27   : > { %402 = vmatpush1.bf16.msra.mxu0 %v392_v22 }
  0x28   : > { %825 = vmatpush3.bf16.msra.mxu1 %v917_v26  ;;  %862 = vmatprep.subr.bf16.mxu0 %v951_v4 }
  0x29   : > { %826 = vmatprep.subr.bf16.mxu1 %v918_v27 }
  0x2a   : > { %796 = vmatmul.mubr.msk.bf16.vlgmr.msra.gmra.mrb[0].mxu0 %vm383_vm1, %v908_v23 }
  0x2b   : > { %439 = vmatprep.mubr.bf16.mxu0 %v950_v5  ;;  %v953_v5 = vmov 0.0  }
  0x2c   : > { %827 = vmatpush3.bf16.msra.mxu1 %v919_v29 }
  0x2d   : > { %828 = vmatprep.subr.bf16.mxu1 %v920_v30 }
  0x30   : > { %829 = vmatpush3.bf16.msra.mxu1 %v921_v31 }
  0x31   : > { %830 = vmatprep.subr.bf16.mxu1 %v922_v32 }
  0x32   : > { %797 = vmatmul.mubr.msk.bf16.gmra.mrb[4].mxu0 %vm383_vm1, %v909_v28 }
  0x33   : > { %859 = vmatprep.mubr.msk.f32.mxu0 %vm952_vm2, %v953_v5 }
  0x34   : > { %831 = vmatpush3.bf16.msra.mxu1 %v923_v33 }
  0x35   : > { %832 = vmatprep.subr.bf16.mxu1 %v924_v34 }
  0x38   : > { %833 = vmatpush3.bf16.msra.mxu1 %v925_v35 }
  0x99   : > { %v331_v36 = vpop.permute.xlu0 %330 }
  0x9a   : > { %v341_v45 = vpop.permute.xlu1 %340 }
  0x9d   : > { %v336_v40 = vpop.permute.xlu0 %335 }
  0x9e   : > { %v346_v56 = vpop.permute.xlu1 %345 }
  0xfd   : > { %v431_v37 = vpop.f32.mrb[0].mxu0 }
  0xfe   : > { %v432_v38 = vadd.f32 %v431_v37, %v331_v36  ;;  %v433_v39 = vpop.f32.mrb[1].mxu0 }
  0xff   : > { %v434_v41 = vadd.f32 %v433_v39, %v331_v36  ;;  %v435_v42 = vpop.f32.mrb[2].mxu0 }
 0x100   : > { %v436_v43 = vadd.f32 %v435_v42, %v336_v40  ;;  %v437_v44 = vpop.f32.mrb[3].mxu0  ;;  %v450_v47 = vmax.f32 %v432_v38, 0.0 }
 0x101   : > { %v438_v46 = vadd.f32 %v437_v44, %v336_v40  ;;  %v451_v49 = vmax.f32 %v434_v41, 0.0 }
 0x102   : > { %v452_v48 = vmax.f32 %v436_v43, 0.0 }
 0x103   : > { %v453_v50 = vmax.f32 %v438_v46, 0.0 }
 0x104   : > { %v458_v51 = vpack.c.bf16 %v452_v48, %v450_v47 }
 0x105   : > { %v441_v52 = vpop.f32.mrb[4].mxu0  ;;  %v459_v53 = vpack.c.bf16 %v453_v50, %v451_v49 }
 0x106   : > { %v442_v54 = vadd.f32 %v441_v52, %v341_v45  ;;  %v443_v55 = vpop.f32.mrb[5].mxu0 }
 0x107   : > { %v444_v57 = vadd.f32 %v443_v55, %v341_v45  ;;  %v445_v58 = vpop.f32.mrb[6].mxu0  ;;  %622 = vmatprep.mubr.bf16.mxu1 %v459_v53 }
 0x108   : > { %v446_v59 = vadd.f32 %v445_v58, %v346_v56  ;;  %v447_v60 = vpop.f32.mrb[7].mxu0  ;;  %623 = vmatmul.mubr.bf16.vlgmr.msra.gmra.mrb[0].mxu1 %v458_v51  ;;  %v454_v62 = vmax.f32 %v442_v54, 0.0 }
 0x109   : > { %v448_v61 = vadd.f32 %v447_v60, %v346_v56  ;;  %v455_v0 = vmax.f32 %v444_v57, 0.0 }
 0x10a   : > { %v456_v63 = vmax.f32 %v446_v59, 0.0 }
 0x10b   : > { %v457_v1 = vmax.f32 %v448_v61, 0.0 }
 0x10c   : > { %v460_v2 = vpack.c.bf16 %v456_v63, %v454_v62 }
 0x10d   : > { %v461_v3 = vpack.c.bf16 %v457_v1, %v455_v0 }
 0x10f   : > { %630 = vmatprep.mubr.bf16.mxu1 %v461_v3 }
 0x110   : > { %631 = vmatmul.mubr.bf16.gmra.mrb[4].mxu1 %v460_v2 }
 0x1db   : > { %v834_v6 = vpop.f32.mrb[0].mxu1 }
 0x1dc   : > { %v835_v7 = vpop.f32.mrb[1].mxu1 }
 0x1dd   : > { %v836_v8 = vadd.f32 %v835_v7, %v834_v6  ;;  %v837_v9 = vpop.f32.mrb[2].mxu1 }
 0x1de   : > { %v838_v10 = vpop.f32.mrb[3].mxu1 }
 0x1df   : > { %v839_v11 = vadd.f32 %v838_v10, %v837_v9 }
 0x1e1   : > { %v863_v12 = vpack.c.bf16 %v839_v11, %v836_v8 }
 0x1e3   : > { %v840_v13 = vpop.f32.mrb[4].mxu1  ;;  %864 = vmatpush3.bf16.msra.mxu0 %v863_v12 }
 0x1e4   : > { %v841_v14 = vpop.f32.mrb[5].mxu1  ;;  %865 = vmatprep.subr.bf16.mxu0 %v951_v4 }
 0x1e5   : > { %v842_v15 = vadd.f32 %v841_v14, %v840_v13  ;;  %v843_v16 = vpop.f32.mrb[6].mxu1 }
 0x1e6   : > { %v844_v17 = vpop.f32.mrb[7].mxu1 }
 0x1e7   : > { %v845_v18 = vadd.f32 %v844_v17, %v843_v16 }
 0x1e9   : > { %v866_v19 = vpack.c.bf16 %v845_v18, %v842_v15 }
 0x1eb   : > { %867 = vmatpush3.bf16.msra.mxu0 %v866_v19 }
 0x1ee   : > { %860 = vmatmul.mubr.msk.f32.vlgmr.msra.gmra.mrb[8].mxu0 %vm640_vm3, %v639_v20 }
 0x2c1   : > { %v710_v22 = vpop.f32.mrb[8].mxu0 }
 0x2c2   : > { %v715_v23 = vadd.f32 %v714_v21, %v710_v22  ;;  %v861_v24 = vpop.f32.mrb[9].mxu0 }
 0x2c4   : > { %717 = vst.msk [vmem:[%s313_s9] sm:$0x1] %vm716_vm4, %v715_v23 }
 0x2c5 PF: > { %p13_p9 = scmp.ge.s32.totalorder %s1006_s25, 4   ;;  %s1122_s21 = smov %s944_s22 }
 0x2c6   : > { %s1123_s22 = smov %s1015_s28  ;;  %s1124_s23 = smov %s1006_s25 }
 0x2c7   :  { %15 = sbr.rel (!%p13_p9) target bundleno = 2 (0x2), region = 120 }

</bundles_post_ra>
